<compile_context>
chip_gen: v7x
topology: tpu7x:2x2x1
jax: 0.10.0
libtpu: 0.0.40
codegen_flags: <defaults>
</compile_context>

<pallas_src>
import functools

import jax
import jax.numpy as jnp
from jax.experimental import pallas as pl
from jax.experimental.pallas import tpu as pltpu

BN_EPS = 1e-5
LANE = 128
VMEM_TILE_BUDGET = 12 * 1024 * 1024   # target per-step working set (v7x-safe)
VMEM_LIMIT = 48 * 1024 * 1024         # scoped VMEM request (<= ~48 MiB for v7x)


def _round_up(x, m):
    return (x + m - 1) // m * m


def _conv_stats_kernel(xm_ref, xh_ref, w_ref, y_ref, st_ref, *,
                       k, stride, tl, l_out, c1):
    """Pass 1: conv tile via one K*C1 contraction + per-channel sum / sumsq.

    xm_ref: (1, tl, stride*C1)   main (stride-folded, channels-last) input block
    xh_ref: (1, tl, stride*C1)   next block (only its first (K-1)//stride rows used: halo)
    w_ref : (K*C1, C2p)          merged weight matrix
    y_ref : (1, tl, C2p)         conv output tile
    st_ref: (1, 8, C2p)          per-batch-element stats (row0=sum, row1=sumsq)
    """
    lt = pl.program_id(1)
    hneed = (k - 1) // stride                      # halo rows needed (folded)

    xm = xm_ref[0]                                 # (tl, stride*c1)
    if hneed > 0:
        xw = jnp.concatenate([xm, xh_ref[0, :hneed, :]], axis=0)
    else:
        xw = xm

    taps = []
    for j in range(k):                             # static unroll; slices only
        r0 = j // stride
        c0 = (j % stride) * c1
        taps.append(xw[r0:r0 + tl, c0:c0 + c1])
    patches = taps[0] if k == 1 else jnp.concatenate(taps, axis=-1)   # (tl, K*C1)

    acc = jnp.dot(patches, w_ref[...], preferred_element_type=jnp.float32)
    y_ref[0] = acc.astype(y_ref.dtype)

    # Per-channel batch stats; mask rows past l_out in the ragged last tile.
    row = lt * tl + jax.lax.broadcasted_iota(jnp.int32, (tl, 1), 0)
    accm = jnp.where(row < l_out, acc, 0.0)
    upd = jnp.concatenate(
        [jnp.sum(accm, axis=0, keepdims=True),
         jnp.sum(accm * accm, axis=0, keepdims=True),
         jnp.zeros((6, accm.shape[1]), jnp.float32)],
        axis=0)[None]                              # (1, 8, C2p)

    @pl.when(lt == 0)
    def _():
        st_ref[...] = jnp.zeros_like(st_ref)

    st_ref[...] += upd


def _norm_act_kernel(y_ref, ss_ref, o_ref, *, c2):
    """Pass 2: relu(y*scale+shift), transposed + pad-channels-sliced in place.

    y_ref : (1, tl2, C2p);  ss_ref: (2, C2p);  o_ref: (1, C2, tl2)
    """
    scale = ss_ref[0:1, :]
    shift = ss_ref[1:2, :]
    r = jnp.maximum(y_ref[0] * scale + shift, 0.0)          # (tl2, C2p)
    o_ref[0] = jnp.transpose(r)[:c2, :].astype(o_ref.dtype)


@functools.partial(jax.jit, static_argnames=("stride", "padding"))
def conv_norm_act(x, weight, bias, gamma, beta, *, stride, padding):
    """x: (N, C1, L) f32; weight: (C2, C1, K); bias/gamma/beta: (C2,).
    Returns (N, C2, L_out) f32, matching PyTorch ConvNormAct.forward (train mode)."""
    del bias  # cancelled exactly by BatchNorm's batch-mean subtraction (train mode)

    n, c1, length = x.shape
    c2, _, k = weight.shape
    l_tot = length + 2 * padding
    l_out = (l_tot - k) // stride + 1
    c2p = _round_up(c2, LANE)
    c1f = stride * c1
    m = n * l_out

    # ---- pass-1 L tile: bounded VMEM footprint (double-buffered x/y + temps) --
    row_bytes1 = 4 * (4 * c1f + 4 * c2p)
    tl1 = min(1024, max(8, VMEM_TILE_BUDGET // row_bytes1), _round_up(l_out, 8))
    tl1 = max(8, (tl1 // 8) * 8)
    num_lt = pl.cdiv(l_out, tl1)

    # Channels-last, conv-padded, stride-folded input (single XLA layout pass;
    # the extra tail padding guarantees the +1 halo block always exists).
    lf_pad = max((num_lt + 1) * tl1, -(-l_tot // stride))
    l_pad = lf_pad * stride
    x_t = jnp.transpose(x, (0, 2, 1)).astype(jnp.float32)          # (N, L, C1)
    x_t = jnp.pad(x_t, ((0, 0), (padding, l_pad - length - padding), (0, 0)))
    x_f = x_t.reshape(n, lf_pad, c1f)                               # free reshape

    # Weights as one (K*C1, C2p) contraction matrix; lane axis padded to 128k.
    w2 = jnp.transpose(weight, (2, 1, 0)).astype(jnp.float32).reshape(k * c1, c2)
    w2 = jnp.pad(w2, ((0, 0), (0, c2p - c2)))

    kern1 = functools.partial(_conv_stats_kernel, k=k, stride=stride, tl=tl1,
                              l_out=l_out, c1=c1)
    y, stats = pl.pallas_call(
        kern1,
        out_shape=(
            jax.ShapeDtypeStruct((n, l_out, c2p), jnp.float32),
            jax.ShapeDtypeStruct((n, 8, c2p), jnp.float32),   # row0=sum, row1=sumsq
        ),
        grid_spec=pltpu.PrefetchScalarGridSpec(
            num_scalar_prefetch=0,
            grid=(n, num_lt),
            in_specs=[
                pl.BlockSpec((1, tl1, c1f), lambda b, t: (b, t, 0)),
                pl.BlockSpec((1, tl1, c1f), lambda b, t: (b, t + 1, 0)),  # halo
                pl.BlockSpec((k * c1, c2p), lambda b, t: (0, 0)),
            ],
            out_specs=(
                pl.BlockSpec((1, tl1, c2p), lambda b, t: (b, t, 0)),
                pl.BlockSpec((1, 8, c2p), lambda b, t: (b, 0, 0)),
            ),
        ),
        compiler_params=pltpu.CompilerParams(
            dimension_semantics=("parallel", "arbitrary"),
            vmem_limit_bytes=VMEM_LIMIT,
        ),
    )(x_f, x_f, w2)

    # Tiny per-channel math (f32): fold BN into one scale/shift pair.
    ysum = jnp.sum(stats[:, 0, :], axis=0)
    yssq = jnp.sum(stats[:, 1, :], axis=0)
    mean = ysum / m
    var = jnp.maximum(yssq / m - mean * mean, 0.0)
    gpad = jnp.pad(gamma.astype(jnp.float32), (0, c2p - c2))
    bpad = jnp.pad(beta.astype(jnp.float32), (0, c2p - c2))
    scale = gpad * jax.lax.rsqrt(var + BN_EPS)
    shift = bpad - mean * scale
    ss = jnp.stack([scale, shift], axis=0)                        # (2, C2p)

    # ---- pass 2: fused scale/shift + ReLU + transpose straight to (N, C2, L_out)
    row_bytes2 = 4 * (4 * c2p + 2 * c2)
    if l_out >= 128:
        tl2 = min(2048, max(128, VMEM_TILE_BUDGET // row_bytes2), l_out)
        tl2 = max(128, (tl2 // 128) * 128)
    else:
        tl2 = l_out
    num_lt2 = pl.cdiv(l_out, tl2)

    kern2 = functools.partial(_norm_act_kernel, c2=c2)
    out = pl.pallas_call(
        kern2,
        out_shape=jax.ShapeDtypeStruct((n, c2, l_out), jnp.float32),
        grid_spec=pltpu.PrefetchScalarGridSpec(
            num_scalar_prefetch=0,
            grid=(n, num_lt2),
            in_specs=[
                pl.BlockSpec((1, tl2, c2p), lambda b, t: (b, t, 0)),
                pl.BlockSpec((2, c2p), lambda b, t: (0, 0)),
            ],
            out_specs=pl.BlockSpec((1, c2, tl2), lambda b, t: (b, 0, t)),
        ),
        compiler_params=pltpu.CompilerParams(
            dimension_semantics=("parallel", "parallel"),
            vmem_limit_bytes=VMEM_LIMIT,
        ),
    )(y, ss)
    return out


def _reference(x, weight, bias, gamma, beta, *, stride, padding):
    """Pure-JAX reference replicating PyTorch Conv1d + BatchNorm1d(train) + ReLU."""
    y = jax.lax.conv_general_dilated(
        x, weight, window_strides=(stride,), padding=[(padding, padding)],
        dimension_numbers=("NCH", "OIH", "NCH"),
        precision=jax.lax.Precision.HIGHEST)
    y = y + bias[None, :, None]
    mean = jnp.mean(y, axis=(0, 2), keepdims=True)
    var = jnp.mean((y - mean) ** 2, axis=(0, 2), keepdims=True)
    y_hat = (y - mean) / jnp.sqrt(var + BN_EPS)
    y_hat = y_hat * gamma[None, :, None] + beta[None, :, None]
    return jnp.maximum(y_hat, 0.0)


if __name__ == "__main__":
    # Small shapes consistent with the module: Conv1d expects (N, C_in, L).
    N, C1, C2, L = 2, 4, 8, 16
    K, S, P = 3, 1, 1

    key = jax.random.PRNGKey(0)
    kx, kw, kb = jax.random.split(key, 3)
    x = jax.random.normal(kx, (N, C1, L), dtype=jnp.float32)
    weight = jax.random.normal(kw, (C2, C1, K), dtype=jnp.float32) * 0.1
    bias = jax.random.normal(kb, (C2,), dtype=jnp.float32) * 0.1
    gamma = jnp.ones((C2,), dtype=jnp.float32)    # fresh BatchNorm1d weight
    beta = jnp.zeros((C2,), dtype=jnp.float32)    # fresh BatchNorm1d bias

    out = conv_norm_act(x, weight, bias, gamma, beta, stride=S, padding=P)
    out = jax.block_until_ready(out)

    ref = _reference(x, weight, bias, gamma, beta, stride=S, padding=P)
    assert out.shape == (N, C2, (L + 2 * P - K) // S + 1)
    assert jnp.allclose(out, ref, atol=1e-3, rtol=1e-3), "mismatch vs JAX reference"

    print("KERNEL_OK")
</pallas_src>

<mosaic_0001>
module attributes {stable_mosaic.version = 11 : i64} {
  func.func @_conv_stats_kernel(%arg0: i32, %arg1: i32, %arg2: memref<1x16x4xf32, #tpu.memory_space<vmem>>, %arg3: memref<1x16x4xf32, #tpu.memory_space<vmem>>, %arg4: memref<12x128xf32, #tpu.memory_space<vmem>>, %arg5: memref<1x16x128xf32, #tpu.memory_space<vmem>>, %arg6: memref<1x8x128xf32, #tpu.memory_space<vmem>>) attributes {dimension_semantics = [#tpu.dimension_semantics<parallel>, #tpu.dimension_semantics<arbitrary>], iteration_bounds = array<i64: 2, 1>, scalar_prefetch = 0 : i64, scratch_operands = 0 : i64, tpu.core_type = #tpu.core_type<tc>, window_params = [{transform_indices = @transform_0, window_bounds = array<i64: 1, 16, 4>}, {transform_indices = @transform_1, window_bounds = array<i64: 1, 16, 4>}, {pipeline_mode = #tpu.pipeline_mode<synchronous>, transform_indices = @transform_2, window_bounds = array<i64: 12, 128>}, {transform_indices = @transform_3, window_bounds = array<i64: 1, 16, 128>}, {transform_indices = @transform_4, window_bounds = array<i64: 1, 8, 128>}]} {
    %c0 = arith.constant 0 : index
    %c0_0 = arith.constant 0 : index
    %c0_1 = arith.constant 0 : index
    %0 = vector.load %arg2[%c0, %c0_0, %c0_1] : memref<1x16x4xf32, #tpu.memory_space<vmem>>, vector<1x16x4xf32>
    %1 = vector.shape_cast %0 : vector<1x16x4xf32> to vector<16x4xf32>
    %c0_2 = arith.constant 0 : index
    %c0_3 = arith.constant 0 : index
    %c0_4 = arith.constant 0 : index
    %2 = vector.load %arg3[%c0_2, %c0_3, %c0_4] : memref<1x16x4xf32, #tpu.memory_space<vmem>>, vector<1x2x4xf32>
    %3 = vector.shape_cast %2 : vector<1x2x4xf32> to vector<2x4xf32>
    %4 = tpu.concatenate %1, %3 in 0 : vector<16x4xf32>, vector<2x4xf32> -> vector<18x4xf32>
    %5 = vector.extract_strided_slice %4 {offsets = [0, 0], sizes = [16, 4], strides = [1, 1]} : vector<18x4xf32> to vector<16x4xf32>
    %6 = vector.extract_strided_slice %4 {offsets = [1, 0], sizes = [16, 4], strides = [1, 1]} : vector<18x4xf32> to vector<16x4xf32>
    %7 = vector.extract_strided_slice %4 {offsets = [2, 0], sizes = [16, 4], strides = [1, 1]} : vector<18x4xf32> to vector<16x4xf32>
    %8 = tpu.concatenate %5, %6, %7 in 1 : vector<16x4xf32>, vector<16x4xf32>, vector<16x4xf32> -> vector<16x12xf32>
    %c0_5 = arith.constant 0 : index
    %c0_6 = arith.constant 0 : index
    %9 = vector.load %arg4[%c0_5, %c0_6] : memref<12x128xf32, #tpu.memory_space<vmem>>, vector<12x128xf32>
    %cst = arith.constant dense<0.000000e+00> : vector<16x128xf32>
    %10 = tpu.matmul %8, %9, %cst {dimension_numbers = #tpu.dot_dimension_numbers<[1], [0], [0], [1], [0, 0, 1, 1], [], []>} : vector<16x12xf32>, vector<12x128xf32>, vector<16x128xf32> -> vector<16x128xf32>
    %c0_7 = arith.constant 0 : index
    %c0_8 = arith.constant 0 : index
    %c0_9 = arith.constant 0 : index
    %11 = vector.load %arg5[%c0_7, %c0_8, %c0_9] : memref<1x16x128xf32, #tpu.memory_space<vmem>>, vector<1x16x128xf32>
    %12 = vector.shape_cast %11 : vector<1x16x128xf32> to vector<16x128xf32>
    %13 = vector.shape_cast %10 : vector<16x128xf32> to vector<1x16x128xf32>
    tpu.vector_store %arg5[%c0_7, %c0_8, %c0_9], %13 {strides = array<i32>} : memref<1x16x128xf32, #tpu.memory_space<vmem>>, vector<1x16x128xf32>,
    %c16_i32 = arith.constant 16 : i32
    %14 = arith.muli %arg1, %c16_i32 : i32
    %15 = tpu.iota {dimensions = array<i32: 0>} : vector<16x1xi32>
    %16 = vector.broadcast %14 : i32 to vector<16x1xi32>
    %17 = arith.addi %16, %15 : vector<16x1xi32>
    %c16_i32_10 = arith.constant 16 : i32
    %18 = vector.broadcast %c16_i32_10 : i32 to vector<16x1xi32>
    %19 = arith.cmpi slt, %17, %18 : vector<16x1xi32>
    %cst_11 = arith.constant 0.000000e+00 : f32
    %20 = vector.shape_cast %19 : vector<16x1xi1> to vector<16x1xi1>
    %21 = vector.broadcast %20 : vector<16x1xi1> to vector<16x128xi1>
    %22 = vector.broadcast %cst_11 : f32 to vector<16x128xf32>
    %23 = arith.select %21, %10, %22 : vector<16x128xi1>, vector<16x128xf32>
    %cst_12 = arith.constant dense<0.000000e+00> : vector<128xf32>
    %24 = vector.multi_reduction <add>, %23, %cst_12 [0] : vector<16x128xf32> to vector<128xf32>
    %25 = vector.shape_cast %24 : vector<128xf32> to vector<1x128xf32>
    %26 = arith.mulf %23, %23 : vector<16x128xf32>
    %cst_13 = arith.constant dense<0.000000e+00> : vector<128xf32>
    %27 = vector.multi_reduction <add>, %26, %cst_13 [0] : vector<16x128xf32> to vector<128xf32>
    %28 = vector.shape_cast %27 : vector<128xf32> to vector<1x128xf32>
    %cst_14 = arith.constant 0.000000e+00 : f32
    %29 = vector.broadcast %cst_14 : f32 to vector<6x128xf32>
    %30 = tpu.concatenate %25, %28, %29 in 0 : vector<1x128xf32>, vector<1x128xf32>, vector<6x128xf32> -> vector<8x128xf32>
    %31 = vector.shape_cast %30 : vector<8x128xf32> to vector<1x8x128xf32>
    %c0_i32 = arith.constant 0 : i32
    %32 = arith.cmpi eq, %arg1, %c0_i32 : i32
    %33 = arith.extui %32 : i1 to i32
    %c0_i32_15 = arith.constant 0 : i32
    %34 = arith.cmpi ne, %33, %c0_i32_15 : i32
    scf.if %34 {
      %cst_22 = arith.constant 0.000000e+00 : f32
      %38 = vector.broadcast %cst_22 : f32 to vector<1x8x128xf32>
      %c0_23 = arith.constant 0 : index
      %c0_24 = arith.constant 0 : index
      %c0_25 = arith.constant 0 : index
      %39 = vector.load %arg6[%c0_23, %c0_24, %c0_25] : memref<1x8x128xf32, #tpu.memory_space<vmem>>, vector<1x8x128xf32>
      tpu.vector_store %arg6[%c0_23, %c0_24, %c0_25], %38 {strides = array<i32>} : memref<1x8x128xf32, #tpu.memory_space<vmem>>, vector<1x8x128xf32>,
    } else {
    }
    %c0_16 = arith.constant 0 : index
    %c0_17 = arith.constant 0 : index
    %c0_18 = arith.constant 0 : index
    %35 = vector.load %arg6[%c0_16, %c0_17, %c0_18] : memref<1x8x128xf32, #tpu.memory_space<vmem>>, vector<1x8x128xf32>
    %36 = arith.addf %35, %31 : vector<1x8x128xf32>
    %c0_19 = arith.constant 0 : index
    %c0_20 = arith.constant 0 : index
    %c0_21 = arith.constant 0 : index
    %37 = vector.load %arg6[%c0_19, %c0_20, %c0_21] : memref<1x8x128xf32, #tpu.memory_space<vmem>>, vector<1x8x128xf32>
    tpu.vector_store %arg6[%c0_19, %c0_20, %c0_21], %36 {strides = array<i32>} : memref<1x8x128xf32, #tpu.memory_space<vmem>>, vector<1x8x128xf32>,
    return
  }
  func.func @transform_0(%arg0: i32, %arg1: i32) -> (i32, i32, i32) {
    %c0_i32 = arith.constant 0 : i32
    %c0_i32_0 = arith.constant 0 : i32
    return %arg0, %arg1, %c0_i32 : i32, i32, i32
  }
  func.func @transform_1(%arg0: i32, %arg1: i32) -> (i32, i32, i32) {
    %c1_i32 = arith.constant 1 : i32
    %0 = arith.addi %arg1, %c1_i32 : i32
    %c0_i32 = arith.constant 0 : i32
    %c0_i32_0 = arith.constant 0 : i32
    return %arg0, %0, %c0_i32 : i32, i32, i32
  }
  func.func @transform_2(%arg0: i32, %arg1: i32) -> (i32, i32) {
    %c0_i32 = arith.constant 0 : i32
    %c0_i32_0 = arith.constant 0 : i32
    %c0_i32_1 = arith.constant 0 : i32
    return %c0_i32, %c0_i32_0 : i32, i32
  }
  func.func @transform_3(%arg0: i32, %arg1: i32) -> (i32, i32, i32) {
    %c0_i32 = arith.constant 0 : i32
    %c0_i32_0 = arith.constant 0 : i32
    return %arg0, %arg1, %c0_i32 : i32, i32, i32
  }
  func.func @transform_4(%arg0: i32, %arg1: i32) -> (i32, i32, i32) {
    %c0_i32 = arith.constant 0 : i32
    %c0_i32_0 = arith.constant 0 : i32
    %c0_i32_1 = arith.constant 0 : i32
    return %arg0, %c0_i32, %c0_i32_0 : i32, i32, i32
  }
}

module attributes {stable_mosaic.version = 11 : i64} {
  func.func @_norm_act_kernel(%arg0: i32, %arg1: i32, %arg2: memref<1x16x128xf32, #tpu.memory_space<vmem>>, %arg3: memref<2x128xf32, #tpu.memory_space<vmem>>, %arg4: memref<1x8x16xf32, #tpu.memory_space<vmem>>) attributes {dimension_semantics = [#tpu.dimension_semantics<parallel>, #tpu.dimension_semantics<parallel>], iteration_bounds = array<i64: 2, 1>, scalar_prefetch = 0 : i64, scratch_operands = 0 : i64, tpu.core_type = #tpu.core_type<tc>, window_params = [{transform_indices = @transform_0, window_bounds = array<i64: 1, 16, 128>}, {pipeline_mode = #tpu.pipeline_mode<synchronous>, transform_indices = @transform_1, window_bounds = array<i64: 2, 128>}, {transform_indices = @transform_2, window_bounds = array<i64: 1, 8, 16>}]} {
    %c0 = arith.constant 0 : index
    %c0_0 = arith.constant 0 : index
    %0 = vector.load %arg3[%c0, %c0_0] : memref<2x128xf32, #tpu.memory_space<vmem>>, vector<1x128xf32>
    %c1 = arith.constant 1 : index
    %c0_1 = arith.constant 0 : index
    %1 = vector.load %arg3[%c1, %c0_1] : memref<2x128xf32, #tpu.memory_space<vmem>>, vector<1x128xf32>
    %c0_2 = arith.constant 0 : index
    %c0_3 = arith.constant 0 : index
    %c0_4 = arith.constant 0 : index
    %2 = vector.load %arg2[%c0_2, %c0_3, %c0_4] : memref<1x16x128xf32, #tpu.memory_space<vmem>>, vector<1x16x128xf32>
    %3 = vector.shape_cast %2 : vector<1x16x128xf32> to vector<16x128xf32>
    %4 = vector.broadcast %0 : vector<1x128xf32> to vector<16x128xf32>
    %5 = arith.mulf %3, %4 : vector<16x128xf32>
    %6 = vector.broadcast %1 : vector<1x128xf32> to vector<16x128xf32>
    %7 = arith.addf %5, %6 : vector<16x128xf32>
    %cst = arith.constant 0.000000e+00 : f32
    %8 = vector.broadcast %cst : f32 to vector<16x128xf32>
    %9 = arith.maximumf %7, %8 : vector<16x128xf32>
    %10 = tpu.transpose %9, [1, 0] : vector<16x128xf32> -> vector<128x16xf32>
    %11 = vector.extract_strided_slice %10 {offsets = [0, 0], sizes = [8, 16], strides = [1, 1]} : vector<128x16xf32> to vector<8x16xf32>
    %c0_5 = arith.constant 0 : index
    %c0_6 = arith.constant 0 : index
    %c0_7 = arith.constant 0 : index
    %12 = vector.load %arg4[%c0_5, %c0_6, %c0_7] : memref<1x8x16xf32, #tpu.memory_space<vmem>>, vector<1x8x16xf32>
    %13 = vector.shape_cast %12 : vector<1x8x16xf32> to vector<8x16xf32>
    %14 = vector.shape_cast %11 : vector<8x16xf32> to vector<1x8x16xf32>
    tpu.vector_store %arg4[%c0_5, %c0_6, %c0_7], %14 {strides = array<i32>} : memref<1x8x16xf32, #tpu.memory_space<vmem>>, vector<1x8x16xf32>,
    return
  }
  func.func @transform_0(%arg0: i32, %arg1: i32) -> (i32, i32, i32) {
    %c0_i32 = arith.constant 0 : i32
    %c0_i32_0 = arith.constant 0 : i32
    return %arg0, %arg1, %c0_i32 : i32, i32, i32
  }
  func.func @transform_1(%arg0: i32, %arg1: i32) -> (i32, i32) {
    %c0_i32 = arith.constant 0 : i32
    %c0_i32_0 = arith.constant 0 : i32
    %c0_i32_1 = arith.constant 0 : i32
    return %c0_i32, %c0_i32_0 : i32, i32
  }
  func.func @transform_2(%arg0: i32, %arg1: i32) -> (i32, i32, i32) {
    %c0_i32 = arith.constant 0 : i32
    %c0_i32_0 = arith.constant 0 : i32
    return %arg0, %c0_i32, %arg1 : i32, i32, i32
  }
}

</mosaic_0001>

<bundles_post_ra>
// kernel: conv_norm_act.3
= control target key start
LH: loop header
LB: loop body
LE: loop exit
PB: predicated region body
PF: predicated region fallthrough
CT: control target
= control target key end

     0   :  { %7 = vsyncpa [#allocation3], 0  ;;  %s598_s0 = inlined_call_operand.vmem [shape: f32[2,16,128], index: 0, kind: input, shape index: {}]   ;;  %s599_s1 = inlined_call_operand.vmem [shape: f32[2,128], index: 1, kind: input, shape index: {}]   ;;  %s600_s2 = inlined_call_operand.hbm [shape: f32[2,8,16], index: 2, kind: output, shape index: {}]  }
   0x1   :  { %9 = vsyncpa [#allocation3 + $0x1], 0  ;;  %s480_s9 = smov 0   ;;  %s482_s10 = smov 0  }
   0x2   :  { %s484_s11 = smov 0   ;;  %s486_s12 = smov 0  }
   0x3   :  { %s488_s13 = smov 0   ;;  %s490_s14 = smov 0  }
   0x4 LB: > { %s313_s15 = sadd.s32 4294967295, %s462_s14   ;;  %s314_s16 = sadd.s32 4294967294, %s462_s14   ;;  %s462_s14 = sphi %s490_s14, %s15_s14   ;;  %s458_s13 = sphi %s488_s13, %s607_s13   ;;  %s454_s12 = sphi %s486_s12, %s606_s12   ;;  %s450_s11 = sphi %s484_s11, %s605_s11   ;;  %s446_s10 = sphi %s482_s10, %s604_s10   ;;  %s442_s9 = sphi %s480_s9, %s603_s9  }
   0x5   : > { %s27_s17 = sadd.s32 1, %s458_s13  ;;  %s85_s18 = sadd.s32 1, %s450_s11 }
   0x6   : > { %p29_p0 = scmp.ge.s32.totalorder %s27_s17, 2  ;;  %p95_p1 = scmp.ne.s32.totalorder %s450_s11, %s446_s10 }
   0x7   : > { %p96_p2 = scmp.eq.s32.totalorder %s313_s15, 1  ;;  %p101_p3 = scmp.ne.s32.totalorder %s446_s10, %s442_s9 }
   0x8   : > { %s609_s17 = smov (%p29_p0, %s27_s17), 0  ;;  %p102_p5 = scmp.eq.s32.totalorder %s314_s16, 1 }
   0x9   : > { %p520_p4 = por %p96_p2, %p95_p1  ;;  %s80_s20 = ssub.s32 %s458_s13, %s609_s17 }
   0xa   : > { %p317_p6 = scmp.ge.s32.totalorder %s462_s14, 1  ;;  %p83_p7 = scmp.eq.s32.totalorder %s80_s20, 0 }
   0xb   : > { %p527_p8 = por %p102_p5, %p101_p3  ;;  %p136_p9 = scmp.lt.s32.totalorder %s462_s14, 3 }
   0xc   : > { %s533_s22 = scalar_select %p83_p7, %s450_s11, %s85_s18  }
   0xd   : > { %p137_p10 = pnand %p317_p6, %p136_p9 }
   0xe   : > { %p163_p11 = scmp.lt.s32.totalorder (!%p137_p10), %s454_s12, 1  ;;  %v321_v0 = vld [vmem:[%s599_s1] ss:$0 sm:$0xff] (!%p137_p10)  ;;  %v322_v1 = vld [vmem:[%s599_s1 + $0x1] ss:$0 sm:$0xff] (!%p137_p10)  ;;  %s159_s4 = sand.u32 (!%p137_p10), 1, %s446_s10  }
   0xf   : > { %140 = sbr.rel (%p137_p10) target bundleno = 176 (0xb0), region = 28  ;;  %s318_s5 = sshll.u32 (!%p137_p10), %s159_s4, 3  ;;  %vm222_vm0 = vcmask (!%p137_p10), 130048  }
  0x10   : > { %s324_s6 = sshll.u32 (!%p137_p10), %s454_s12, 7  ;;  %s161_s7 = scalar_lea.vmem (!%p137_p10), [#allocation2], %s318_s5 }
  0x11   : > { %s239_s8 = sshll.u32 (!%p137_p10), %s161_s7, 4  ;;  %s551_s18 = scalar_lea.hbm (!%p137_p10), %s600_s2, %s324_s6  ;;  %s553_s8 = int_to_ptr.vmem [resolvable:$true] %s239_s8 }
  0x12   : > { %s225_s20 = scalar_lea.sflag (!%p137_p10), [#allocation3], %s159_s4 }
  0x16   : > { %s164_s23 = scalar_select %p163_p11, %s454_s12, 1 }
  0x17   : > { %s464_s12 = smov [#allocation2]  }
  0x18   : > { %s327_s24 = sshll.u32 %s164_s23, 4  ;;  %s384_s23 = scalar_lea.vmem %s553_s8, 128 }
  0x19   : > { %s170_s29 = scalar_lea.vmem %s598_s0, %s327_s24  ;;  %p385_p12 = scmp.ne.s32.totalorder %s553_s8, %s384_s23 }
  0x1a   : > { %v174_v2 = vld [vmem:[%s170_s29] sm:$0xff]  ;;  %v175_v3 = vld [vmem:[%s170_s29 + $0x8] sm:$0xff]  ;;  %s388_s24 = sshll.u32 %s464_s12, 4  ;;  %s389_s24 = int_to_ptr.vmem [resolvable:$false] %s388_s24 }
  0x1b   : > { %v180_v4 = vmul.f32 %v321_v0, %v174_v2  ;;  %v181_v5 = vmul.f32 %v321_v0, %v175_v3  ;;  %p386_p13 = pnand %p385_p12, %p520_p4  ;;  %s390_s25 = scalar_lea.vmem %s389_s24, 256 }
  0x1c   : > { %p391_p1 = scmp.lt.s32.totalorder %s553_s8, %s389_s24  ;;  %p392_p2 = scmp.lt.s32.totalorder %s390_s25, %s384_s23 }
  0x1d   : > { %v186_v6 = vadd.f32 %v322_v1, %v180_v4  ;;  %v187_v7 = vadd.f32 %v322_v1, %v181_v5  ;;  %p387_p0 = pneg %p386_p13 }
  0x1e   : > { %p393_p3 = por %p392_p2, %p391_p1 }
  0x1f   : > { %v188_v8 = vmax.f32 %v186_v6, 0.0  ;;  %v189_v9 = vmax.f32 %v187_v7, 0.0 }
  0x20   : > { %p394_p5 = pnand %p393_p3, %p387_p0 }
  0x21   : > { %190 = vxpose.xlu0.b32.start [1/2] (short) (narrow) %v188_v8, 8 }
  0x25   : > { %191 = vxpose.xlu0.b32.end [2/2] (short) (narrow) %v189_v9, 8 }
  0xa1   : > { %v206_v10 = vpop.trf.xlu0 }
  0xa2   : > { %223 = vst.msk [vmem:[%s161_s7] sm:$0xff] %vm222_vm0, %v206_v10 }
  0xa3   : > { %397 = shalt.err (!%p394_p5)
}
  0xa4   : > { %s398_s26 = scalar_lea.hbm %s551_s18, 128  ;;  %s402_s29 = scalar_lea.hbm %s600_s2, 256 }
  0xa5   : > { %p399_p6 = scmp.ne.s32.totalorder %s551_s18, %s398_s26  ;;  %p403_p10 = scmp.lt.u32.totalorder %s551_s18, %s600_s2 }
  0xa6   : > { %p404_p11 = scmp.lt.u32.totalorder %s402_s29, %s398_s26  ;;  %p406_p13 = scmp.lt.u32.totalorder %s398_s26, %s551_s18 }
  0xa7   : > { %p400_p7 = pnand %p399_p6, %p520_p4 }
  0xa8   : > { %p405_p12 = por %p404_p11, %p403_p10 }
  0xa9   : > { %p401_p9 = pneg %p400_p7 }
  0xaa   : > { %p407_p0 = por %p406_p13, %p405_p12 }
  0xac   : > { %p408_p1 = pnand %p407_p0, %p401_p9 }
  0xae   : > { %411 = shalt.err (!%p408_p1)
}
  0xaf   : > { %328 = dma.vmem_to_hbm [thread:$0]  (%p520_p4), %s553_s8, 128, %s551_s18, %s225_s20  }
  0xb0 PF: > { %p334_p2 = scmp.ge.s32.totalorder %s462_s14, 2  ;;  %s251_s4 = sand.u32 1, %s442_s9  }
  0xb1   : > { %s252_s5 = scalar_lea.sflag [#allocation3], %s251_s4 }
  0xb2   : > { %p331_p3 = pnand %p334_p2, %p527_p8 }
  0xb4   : > { %437 = dma.done.wait (!%p331_p3), %s252_s5, 128  }
  0xb5   : > { %439 = vsyncadd (!%p331_p3), %s252_s5, 4294967168  ;;  %s15_s14 = sadd.s32 1, %s462_s14   ;;  %s603_s9 = smov %s446_s10 }
  0xb6   : > { %p12_p5 = scmp.ge.s32.totalorder %s15_s14, 4   ;;  %s604_s10 = smov %s450_s11 }
  0xb7   : > { %s605_s11 = smov %s533_s22  ;;  %s606_s12 = smov %s458_s13 }
  0xb8   : > { %s607_s13 = smov %s609_s17  ;;  %14 = sbr.rel (!%p12_p5) target bundleno = 4 (0x4), region = 63 }
  0xbf   :  { %257 = vsyncpa [#allocation3], 1 }
  0xc0   :  { %259 = vsyncpa [#allocation3 + $0x1], 1 }

// kernel: conv_norm_act.2
= control target key start
LH: loop header
LB: loop body
LE: loop exit
PB: predicated region body
PF: predicated region fallthrough
CT: control target
= control target key end

     0   :  { %s715_s15 = smov 0   ;;  %s717_s16 = smov 0   ;;  %s769_s0 = inlined_call_operand.vmem [shape: f32[2,32,4], index: 0, kind: input, shape index: {}, may-alias: {0,1}]   ;;  %s770_s1 = inlined_call_operand.vmem [shape: f32[2,32,4], index: 1, kind: input, shape index: {}, may-alias: {0,1}]   ;;  %s771_s2 = inlined_call_operand.vmem [shape: f32[12,128], index: 2, kind: input, shape index: {}]   ;;  %s772_s3 = inlined_call_operand.vmem [shape: f32[2,16,128], index: 3, kind: output, shape index: {0}]   ;;  %s773_s4 = inlined_call_operand.vmem [shape: f32[2,8,128], index: 4, kind: output, shape index: {1}]  }
   0x1   :  { %s719_s17 = smov 0  }
   0x2 LB: > { %s27_s18 = sadd.s32 1, %s681_s16  ;;  %p600_p0 = scmp.ge.s32.totalorder %s685_s17, 1  ;;  %s685_s17 = sphi %s719_s17, %s15_s17   ;;  %s681_s16 = sphi %s717_s16, %s775_s16   ;;  %s677_s15 = sphi %s715_s15, %s774_s15  }
   0x3   : > { %p29_p1 = scmp.ge.s32.totalorder %s27_s18, 2  ;;  %p207_p2 = scmp.lt.s32.totalorder %s685_s17, 3 }
   0x5   : > { %s777_s18 = smov (%p29_p1, %s27_s18), 0  ;;  %p208_p3 = pnand %p600_p0, %p207_p2 }
   0x6   : > { %p256_p4 = scmp.lt.s32.totalorder (!%p208_p3), %s677_s15, 1  ;;  %v327_v0 = vld [vmem:[%s771_s2] sm:$0xff] (!%p208_p3)  ;;  %v328_v1 = vld [vmem:[%s771_s2 + $0x8] sm:$0xf] (!%p208_p3)  ;;  %vm336_vm0 = vcmask (!%p208_p3), 1043456   ;;  %vm687_vm1 = vmmov (!%p208_p3), 1  }
   0x7   : > { %211 = sbr.rel (%p208_p3) target bundleno = 374 (0x176), region = 32  ;;  %v629_v2 = vpack.c.bf16 (!%p208_p3), %v328_v1, %v327_v0  ;;  %vm630_vm2 = vmpackc.low (!%p208_p3), %vm336_vm0, %vm687_vm1  ;;  %vm297_vm3 = vcmask (!%p208_p3), 1046528   ;;  %vm309_vm4 = vcmask (!%p208_p3), 1045504   ;;  %s688_s5 = smov (!%p208_p3), 4   ;;  %vm321_vm5 = vcmask (!%p208_p3), 31744  }
   0x8   : > { %s689_s6 = smov (!%p208_p3), 8   ;;  %vm324_vm6 = vcmask (!%p208_p3), 64512   ;;  %vm329_vm7 = vcmask (!%p208_p3), 97280   ;;  %vm448_vm8 = vcmask (!%p208_p3), 1040384   ;;  %vm450_vm9 = vcmask (!%p208_p3), 1041408  }
   0x9   : > { %631 = vmatprep.subr.msk.bf16.mxu0 (!%p208_p3), %vm630_vm2, %v629_v2 }
   0xa   : > { %634 = vmatpush3.bf16.msk.msra.mxu0 (!%p208_p3), %vm630_vm2, %v629_v2 }
   0xe   : > { %s779_s15 = smov (!%p256_p4, %s677_s15), 1 }
   0xf   : > { %s613_s23 = sshll.u32 %s779_s15, 5  ;;  %s616_s7 = sshll.u32 %s779_s15, 4 }
  0x10   : > { %s263_s26 = scalar_lea.vmem %s769_s0, %s613_s23  ;;  %s615_s27 = sadd.s32 16, %s613_s23 }
  0x11   : > { %v291_v3 = vld [vmem:[%s263_s26] sm:$0xff]  ;;  %v292_v4 = vld [vmem:[%s263_s26 + $0x8] sm:$0xff]  ;;  %s274_s30 = scalar_lea.vmem %s770_s1, %s615_s27  ;;  %s285_s10 = scalar_lea.vmem %s772_s3, %s616_s7 }
  0x12   : > { %v298_v5 = vrot.slane %v291_v3, 1  ;;  %v299_v6 = vrot.slane %v292_v4, 1  ;;  %v310_v7 = vrot.slane %v291_v3, 2  ;;  %v311_v8 = vrot.slane %v292_v4, 2  ;;  %v293_v9 = vld [vmem:[%s274_s30] sm:$0x3] }
  0x13   : > { %v301_v10 = vrot.slane %v293_v9, 1  ;;  %v313_v11 = vrot.slane %v293_v9, 2  ;;  %s607_s11 = sshll.u32 %s779_s15, 3 }
  0x14   : > { %v300_v12 = vsel %vm297_vm3, %v298_v5, %v299_v6  ;;  %v312_v13 = vsel %vm309_vm4, %v310_v7, %v311_v8  ;;  %s290_s14 = scalar_lea.vmem %s773_s4, %s607_s11 }
  0x15   : > { %303 = vrot.lane.b32.xlu0 %v300_v12, %s688_s5  ;;  %315 = vrot.lane.b32.xlu1 %v312_v13, %s689_s6  ;;  %v302_v14 = vsel %vm297_vm3, %v299_v6, %v301_v10  ;;  %v314_v15 = vsel %vm309_vm4, %v311_v8, %v313_v11 }
  0x19   : > { %305 = vrot.lane.b32.xlu0 %v302_v14, %s688_s5  ;;  %317 = vrot.lane.b32.xlu1 %v314_v15, %s689_s6 }
  0x87   : > { %v304_v16 = vpop.permute.xlu0 %303  ;;  %v316_v17 = vpop.permute.xlu1 %315 }
  0x88   : > { %v322_v18 = vsel %vm321_vm5, %v291_v3, %v304_v16 }
  0x89   : > { %v325_v19 = vsel %vm324_vm6, %v322_v18, %v316_v17 }
  0x8a   : > { %626 = vmatprep.mubr.msk.f32.mxu0 %vm329_vm7, %v325_v19 }
  0x8b   : > { %v306_v20 = vpop.permute.xlu0 %305  ;;  %v318_v21 = vpop.permute.xlu1 %317 }
  0x8c   : > { %v323_v22 = vsel %vm321_vm5, %v292_v4, %v306_v20 }
  0x8d   : > { %v326_v23 = vsel %vm324_vm6, %v323_v22, %v318_v21 }
  0x8e   : > { %627 = vmatmul.mubr.msk.f32.vlgmr.msra.gmra.mrb[0].mxu0 %vm329_vm7, %v326_v23 }
 0x161   : > { %v628_v24 = vpop.f32.mrb[0].mxu0 }
 0x162   : > { %v440_v25 = vmul.f32 %v628_v24, %v628_v24  ;;  %v406_v26 = vpop.f32.mrb[1].mxu0  ;;  %416 = vst [vmem:[%s285_s10 + $0x8] sm:$0xff] %v628_v24 }
 0x163   : > { %415 = vst [vmem:[%s285_s10] sm:$0xff] %v406_v26  ;;  %v432_v27 = vadd.f32 %v628_v24, %v406_v26  ;;  %v439_v28 = vmul.f32 %v406_v26, %v406_v26 }
 0x165   : > { %v433_v29 = vrot.slane %v432_v27, 4  ;;  %v441_v30 = vadd.f32 %v440_v25, %v439_v28 }
 0x167   : > { %v434_v31 = vadd.f32 %v433_v29, %v432_v27  ;;  %v442_v32 = vrot.slane %v441_v30, 4 }
 0x169   : > { %v435_v33 = vrot.slane %v434_v31, 2  ;;  %v443_v34 = vadd.f32 %v442_v32, %v441_v30 }
 0x16b   : > { %v436_v35 = vadd.f32 %v435_v33, %v434_v31  ;;  %v444_v36 = vrot.slane %v443_v34, 2 }
 0x16d   : > { %v437_v37 = vrot.slane %v436_v35, 1  ;;  %v445_v38 = vadd.f32 %v444_v36, %v443_v34 }
 0x16f   : > { %v446_v39 = vrot.slane %v445_v38, 1  ;;  %v438_v40 = vadd.f32 %v437_v37, %v436_v35 }
 0x171   : > { %v447_v41 = vadd.f32 %v446_v39, %v445_v38 }
 0x173   : > { %v449_v42 = vsel %vm448_vm8, %v438_v40, %v447_v41 }
 0x174   : > { %v451_v43 = vsel %vm450_vm9, %v449_v42, 0.0 }
 0x175   : > { %459 = vst [vmem:[%s290_s14] sm:$0xff] %v451_v43 }
 0x176 PF: > { %s15_s17 = sadd.s32 1, %s685_s17   ;;  %s774_s15 = smov %s681_s16 }
 0x177   : > { %p12_p5 = scmp.ge.s32.totalorder %s15_s17, 4   ;;  %s775_s16 = smov %s777_s18 }
 0x179   :  { %14 = sbr.rel (!%p12_p5) target bundleno = 2 (0x2), region = 81 }

</bundles_post_ra>
